<compile_context>
chip_gen: v5e
topology: v5e:2x2
jax: 0.10.0
libtpu: 0.0.40
codegen_flags: <defaults>
</compile_context>

<pallas_src>
import jax
import jax.numpy as jnp
from jax.experimental import pallas as pl
from jax.experimental.pallas import tpu as pltpu


def _round_up(a, b):
    return ((a + b - 1) // b) * b


def _vmem_budget_bytes():
    """~75% of this generation's physical VMEM, capped at 100 MiB.

    => ~96 MiB usable on v5e/v6e (128 MiB physical), ~48 MiB on v7x (64 MiB physical),
    leaving headroom for Mosaic internal scratch / pipeline bookkeeping.
    """
    try:
        cap = int(pltpu.get_tpu_info().vmem_capacity_bytes)
    except Exception:
        cap = 64 << 20  # conservative fallback (v7x per-TC VMEM)
    return min(int(cap * 0.75), 100 << 20)


# --------------------------------------------------------------------------------------
# Kernels
# --------------------------------------------------------------------------------------
def _ffn_kernel_single_pass(x_ref, w1_ref, b1_ref, w2_ref, b2_ref, o_ref):
    """Resident-weight path: grid = (row_tiles,), whole d_ff processed per row tile."""
    x = x_ref[...].astype(w1_ref.dtype)
    h = jnp.dot(x, w1_ref[...], preferred_element_type=jnp.float32)
    h = jnp.maximum(h + b1_ref[...], 0.0)            # relu(w_1(x)); dropout(eval) = identity
    out = jnp.dot(h.astype(w2_ref.dtype), w2_ref[...], preferred_element_type=jnp.float32)
    o_ref[...] = (out + b2_ref[...]).astype(o_ref.dtype)


def _ffn_kernel_ktiled_accum_out(x_ref, w1_ref, b1_ref, w2_ref, b2_ref, o_ref):
    """d_ff-tiled path, f32 output: accumulate directly into the k-invariant output block."""
    k = pl.program_id(1)
    x = x_ref[...].astype(w1_ref.dtype)
    h = jnp.dot(x, w1_ref[...], preferred_element_type=jnp.float32)
    h = jnp.maximum(h + b1_ref[...], 0.0)
    partial = jnp.dot(h.astype(w2_ref.dtype), w2_ref[...], preferred_element_type=jnp.float32)

    @pl.when(k == 0)
    def _():
        o_ref[...] = partial + b2_ref[...]

    @pl.when(k > 0)
    def _():
        o_ref[...] += partial


def _ffn_kernel_ktiled_scratch(x_ref, w1_ref, b1_ref, w2_ref, b2_ref, o_ref, acc_ref):
    """d_ff-tiled path, non-f32 output: f32 VMEM scratch accumulator."""
    k = pl.program_id(1)

    @pl.when(k == 0)
    def _():
        acc_ref[...] = jnp.zeros_like(acc_ref)

    x = x_ref[...].astype(w1_ref.dtype)
    h = jnp.dot(x, w1_ref[...], preferred_element_type=jnp.float32)
    h = jnp.maximum(h + b1_ref[...], 0.0)
    acc_ref[...] += jnp.dot(h.astype(w2_ref.dtype), w2_ref[...],
                            preferred_element_type=jnp.float32)

    @pl.when(k == pl.num_programs(1) - 1)
    def _():
        o_ref[...] = (acc_ref[...] + b2_ref[...]).astype(o_ref.dtype)


# --------------------------------------------------------------------------------------
# Parameter preparation (hoisted out of the per-call path)
# --------------------------------------------------------------------------------------
def prepare_ffn_params(w1, b1, w2, b2, *, use_bf16=False, tile_m_hint=512,
                       _force_num_k=None):
    """Transpose / pad / (optionally) bf16-cast the nn.Linear parameters ONCE.

    PyTorch nn.Linear layouts: w1 (d_ff, d_model), b1 (d_ff,), w2 (d_model, d_ff), b2 (d_model,).
    """
    d_ff, d_model = w1.shape
    d_model_p = _round_up(d_model, 128)                    # lane-dense (unmasked) stores
    wdtype = jnp.bfloat16 if use_bf16 else jnp.dtype(w1.dtype)
    wsz = jnp.dtype(wdtype).itemsize

    tile_m_hint = max(8, _round_up(tile_m_hint, 8))
    budget = _vmem_budget_bytes()
    d_ff_128 = _round_up(d_ff, 128)

    bias_bytes = 2 * 8 * (d_ff_128 + d_model_p) * 4
    io_tiles = 2 * 2 * tile_m_hint * d_model_p * 4          # x + out tiles, double-buffered

    def _tiled_footprint(t_ff):
        return (2 * 2 * d_model_p * t_ff * wsz              # W1^T & W2^T slices, dbl-buffered
                + io_tiles
                + tile_m_hint * t_ff * 4                    # relu'd intermediate (f32)
                + bias_bytes)

    resident_fp = _tiled_footprint(d_ff_128)                # kt == 1 <=> fully resident weights

    if _force_num_k is not None and _force_num_k > 1:       # test / tuning knob
        kt = int(_force_num_k)
        tile_ff = _round_up(-(-d_ff // kt), 128)
        footprint = _tiled_footprint(tile_ff)
    elif resident_fp <= budget:
        kt, tile_ff, footprint = 1, d_ff_128, resident_fp
    else:
        kt = 2
        while True:
            tile_ff = _round_up(-(-d_ff // kt), 128)
            footprint = _tiled_footprint(tile_ff)
            if footprint <= budget or tile_ff <= 128:
                break
            kt *= 2
    d_ff_p = kt * tile_ff

    w1t = jnp.pad(w1.T, ((0, d_model_p - d_model), (0, d_ff_p - d_ff))).astype(wdtype)
    w2t = jnp.pad(w2.T, ((0, d_ff_p - d_ff), (0, d_model_p - d_model))).astype(wdtype)
    b1r = jnp.pad(b1.reshape(1, d_ff), ((0, 0), (0, d_ff_p - d_ff))).astype(jnp.float32)
    b2r = jnp.pad(b2.reshape(1, d_model), ((0, 0), (0, d_model_p - d_model))).astype(jnp.float32)

    return dict(w1t=w1t, b1=b1r, w2t=w2t, b2=b2r,
                d_model=d_model, d_ff=d_ff, d_model_p=d_model_p, d_ff_p=d_ff_p,
                tile_ff=tile_ff, num_k=kt, tile_m_hint=tile_m_hint,
                footprint=footprint, budget=budget)


# --------------------------------------------------------------------------------------
# Forward
# --------------------------------------------------------------------------------------
def positionwise_ffn_apply(x, params):
    batch, seq, d_model = x.shape
    assert d_model == params["d_model"]
    M = batch * seq
    d_model_p, d_ff_p = params["d_model_p"], params["d_ff_p"]
    tile_ff, kt = params["tile_ff"], params["num_k"]
    w1t, b1r, w2t, b2r = params["w1t"], params["b1"], params["w2t"], params["b2"]
    out_dtype = x.dtype

    # ---- row-tile selection: big tiles, but keep >=2 row tiles for megacore ------------
    tile_m = min(params["tile_m_hint"], _round_up(M, 8))
    while M > 8 and _round_up(M, tile_m) // tile_m < 2 and tile_m > 8:
        tile_m = _round_up(tile_m // 2, 8)
    M_p = _round_up(M, tile_m)
    n_row_tiles = M_p // tile_m

    x2d = jnp.pad(x.reshape(M, d_model), ((0, M_p - M), (0, d_model_p - d_model)))

    use_k_axis = kt > 1
    wsz = w1t.dtype.itemsize
    itm = x2d.dtype.itemsize

    # ---- VMEM limit: actual footprint of the chosen tiles + headroom, clamped to budget --
    vmem = (2 * tile_m * d_model_p * itm                              # x tiles
            + 2 * tile_m * d_model_p * out_dtype.itemsize             # out tiles
            + 2 * 2 * d_model_p * tile_ff * wsz                       # W1^T + W2^T (slices)
            + 2 * 8 * tile_ff * 4 + 2 * 8 * d_model_p * 4             # biases (sublane-padded)
            + tile_m * tile_ff * 4                                    # relu'd intermediate
            + (tile_m * d_model_p * 4
               if (use_k_axis and out_dtype != jnp.float32) else 0))  # scratch accumulator
    vmem_limit = int(min(max(int(vmem * 1.4) + (4 << 20), 32 << 20), params["budget"]))

    cost = pl.CostEstimate(
        flops=4 * M * d_model * params["d_ff"],
        transcendentals=0,
        bytes_accessed=int((x2d.size + M_p * d_model_p) * itm
                           + (w1t.size + w2t.size) * wsz * (n_row_tiles if use_k_axis else 1)
                           + (b1r.size + b2r.size) * 4))

    if not use_k_axis:
        # Resident weights: constant index maps -> DMA'd once, only x/out row tiles stream.
        grid = (n_row_tiles,)
        in_specs = [
            pl.BlockSpec((tile_m, d_model_p), lambda i: (i, 0)),       # x rows
            pl.BlockSpec((d_model_p, d_ff_p), lambda i: (0, 0)),       # W1^T (resident)
            pl.BlockSpec((1, d_ff_p), lambda i: (0, 0)),               # b1
            pl.BlockSpec((d_ff_p, d_model_p), lambda i: (0, 0)),       # W2^T (resident)
            pl.BlockSpec((1, d_model_p), lambda i: (0, 0)),            # b2
        ]
        out_spec = pl.BlockSpec((tile_m, d_model_p), lambda i: (i, 0))
        kernel = _ffn_kernel_single_pass
        scratch = []
        dims = ("parallel",)
    else:
        # d_ff streamed in slices along the (last, "arbitrary") reduction axis.
        grid = (n_row_tiles, kt)
        in_specs = [
            pl.BlockSpec((tile_m, d_model_p), lambda i, k: (i, 0)),    # x rows
            pl.BlockSpec((d_model_p, tile_ff), lambda i, k: (0, k)),   # W1^T d_ff-slice
            pl.BlockSpec((1, tile_ff), lambda i, k: (0, k)),           # b1 slice
            pl.BlockSpec((tile_ff, d_model_p), lambda i, k: (k, 0)),   # W2^T d_ff-slice
            pl.BlockSpec((1, d_model_p), lambda i, k: (0, 0)),         # b2 (tiny, resident)
        ]
        out_spec = pl.BlockSpec((tile_m, d_model_p), lambda i, k: (i, 0))
        if out_dtype == jnp.float32:
            kernel = _ffn_kernel_ktiled_accum_out                      # accumulate in o_ref
            scratch = []
        else:
            kernel = _ffn_kernel_ktiled_scratch
            scratch = [pltpu.VMEM((tile_m, d_model_p), jnp.float32)]
        dims = ("parallel", "arbitrary")

    out2d = pl.pallas_call(
        kernel,
        out_shape=jax.ShapeDtypeStruct((M_p, d_model_p), out_dtype),
        grid_spec=pltpu.PrefetchScalarGridSpec(
            num_scalar_prefetch=0,
            grid=grid,
            in_specs=in_specs,
            out_specs=out_spec,
            scratch_shapes=scratch),
        compiler_params=pltpu.CompilerParams(
            dimension_semantics=dims,
            vmem_limit_bytes=vmem_limit),
        cost_estimate=cost,
    )(x2d, w1t, b1r, w2t, b2r)

    return out2d[:M, :d_model].reshape(batch, seq, d_model)


def positionwise_ffn(x, w1, b1, w2, b2, *, use_bf16=False, tile_m=512):
    """Convenience one-shot wrapper (prefer prepare_ffn_params once + apply per call)."""
    params = prepare_ffn_params(w1, b1, w2, b2, use_bf16=use_bf16, tile_m_hint=tile_m)
    return positionwise_ffn_apply(x, params)


if __name__ == "__main__":
    # Small, deterministic setup consistent with the module's forward.
    batch, seq, d_model, d_ff = 2, 8, 32, 64

    key = jax.random.PRNGKey(0)
    kx, kw1, kb1, kw2, kb2 = jax.random.split(key, 5)

    x = jax.random.normal(kx, (batch, seq, d_model), dtype=jnp.float32)
    # PyTorch nn.Linear parameter shapes: weight (out, in), bias (out,)
    w1 = jax.random.normal(kw1, (d_ff, d_model), dtype=jnp.float32) * 0.1
    b1 = jax.random.normal(kb1, (d_ff,), dtype=jnp.float32) * 0.1
    w2 = jax.random.normal(kw2, (d_model, d_ff), dtype=jnp.float32) * 0.1
    b2 = jax.random.normal(kb2, (d_model,), dtype=jnp.float32) * 0.1

    # Pure-JAX reference (dropout in eval mode == identity).
    ref = jnp.maximum(x @ w1.T + b1, 0.0) @ w2.T + b2

    # 1) Exact-f32 MXU path (resident-weight fast path at this size).
    out_f32 = positionwise_ffn(x, w1, b1, w2, b2, use_bf16=False)
    jax.block_until_ready(out_f32)
    assert out_f32.shape == (batch, seq, d_model)
    assert jnp.allclose(out_f32, ref, atol=1e-4, rtol=1e-4)

    # 2) k-tiled fallback path (forced), exercising the output-block accumulator.
    params_tiled = prepare_ffn_params(w1, b1, w2, b2, use_bf16=False, _force_num_k=2)
    out_tiled = positionwise_ffn_apply(x, params_tiled)
    jax.block_until_ready(out_tiled)
    assert jnp.allclose(out_tiled, ref, atol=1e-4, rtol=1e-4)

    # 3) bf16 MXU path (the recommended fast path at realistic sizes; looser tolerance).
    out_bf16 = positionwise_ffn(x, w1, b1, w2, b2, use_bf16=True)
    jax.block_until_ready(out_bf16)
    assert jnp.allclose(out_bf16, ref, atol=5e-2, rtol=5e-2)

    print("KERNEL_OK")
</pallas_src>

<mosaic_0001>
module attributes {stable_mosaic.version = 11 : i64} {
  func.func @_ffn_kernel_single_pass(%arg0: i32, %arg1: memref<8x128xf32, #tpu.memory_space<vmem>>, %arg2: memref<128x128xf32, #tpu.memory_space<vmem>>, %arg3: memref<1x128xf32, #tpu.memory_space<vmem>>, %arg4: memref<128x128xf32, #tpu.memory_space<vmem>>, %arg5: memref<1x128xf32, #tpu.memory_space<vmem>>, %arg6: memref<8x128xf32, #tpu.memory_space<vmem>>) attributes {dimension_semantics = [#tpu.dimension_semantics<parallel>], iteration_bounds = array<i64: 2>, scalar_prefetch = 0 : i64, scratch_operands = 0 : i64, tpu.core_type = #tpu.core_type<tc>, window_params = [{transform_indices = @transform_0, window_bounds = array<i64: 8, 128>}, {pipeline_mode = #tpu.pipeline_mode<synchronous>, transform_indices = @transform_1, window_bounds = array<i64: 128, 128>}, {pipeline_mode = #tpu.pipeline_mode<synchronous>, transform_indices = @transform_2, window_bounds = array<i64: 1, 128>}, {pipeline_mode = #tpu.pipeline_mode<synchronous>, transform_indices = @transform_3, window_bounds = array<i64: 128, 128>}, {pipeline_mode = #tpu.pipeline_mode<synchronous>, transform_indices = @transform_4, window_bounds = array<i64: 1, 128>}, {transform_indices = @transform_5, window_bounds = array<i64: 8, 128>}]} {
    %c0 = arith.constant 0 : index
    %c0_0 = arith.constant 0 : index
    %0 = vector.load %arg1[%c0, %c0_0] : memref<8x128xf32, #tpu.memory_space<vmem>>, vector<8x128xf32>
    %c0_1 = arith.constant 0 : index
    %c0_2 = arith.constant 0 : index
    %1 = vector.load %arg2[%c0_1, %c0_2] : memref<128x128xf32, #tpu.memory_space<vmem>>, vector<128x128xf32>
    %cst = arith.constant dense<0.000000e+00> : vector<8x128xf32>
    %2 = tpu.matmul %0, %1, %cst {dimension_numbers = #tpu.dot_dimension_numbers<[1], [0], [0], [1], [0, 0, 1, 1], [], []>} : vector<8x128xf32>, vector<128x128xf32>, vector<8x128xf32> -> vector<8x128xf32>
    %c0_3 = arith.constant 0 : index
    %c0_4 = arith.constant 0 : index
    %3 = vector.load %arg3[%c0_3, %c0_4] : memref<1x128xf32, #tpu.memory_space<vmem>>, vector<1x128xf32>
    %4 = vector.broadcast %3 : vector<1x128xf32> to vector<8x128xf32>
    %5 = arith.addf %2, %4 : vector<8x128xf32>
    %cst_5 = arith.constant 0.000000e+00 : f32
    %6 = vector.broadcast %cst_5 : f32 to vector<8x128xf32>
    %7 = arith.maximumf %5, %6 : vector<8x128xf32>
    %c0_6 = arith.constant 0 : index
    %c0_7 = arith.constant 0 : index
    %8 = vector.load %arg4[%c0_6, %c0_7] : memref<128x128xf32, #tpu.memory_space<vmem>>, vector<128x128xf32>
    %cst_8 = arith.constant dense<0.000000e+00> : vector<8x128xf32>
    %9 = tpu.matmul %7, %8, %cst_8 {dimension_numbers = #tpu.dot_dimension_numbers<[1], [0], [0], [1], [0, 0, 1, 1], [], []>} : vector<8x128xf32>, vector<128x128xf32>, vector<8x128xf32> -> vector<8x128xf32>
    %c0_9 = arith.constant 0 : index
    %c0_10 = arith.constant 0 : index
    %10 = vector.load %arg5[%c0_9, %c0_10] : memref<1x128xf32, #tpu.memory_space<vmem>>, vector<1x128xf32>
    %11 = vector.broadcast %10 : vector<1x128xf32> to vector<8x128xf32>
    %12 = arith.addf %9, %11 : vector<8x128xf32>
    %c0_11 = arith.constant 0 : index
    %c0_12 = arith.constant 0 : index
    %13 = vector.load %arg6[%c0_11, %c0_12] : memref<8x128xf32, #tpu.memory_space<vmem>>, vector<8x128xf32>
    tpu.vector_store %arg6[%c0_11, %c0_12], %12 {strides = array<i32>} : memref<8x128xf32, #tpu.memory_space<vmem>>, vector<8x128xf32>,
    return
  }
  func.func @transform_0(%arg0: i32) -> (i32, i32) {
    %c0_i32 = arith.constant 0 : i32
    %c0_i32_0 = arith.constant 0 : i32
    return %arg0, %c0_i32 : i32, i32
  }
  func.func @transform_1(%arg0: i32) -> (i32, i32) {
    %c0_i32 = arith.constant 0 : i32
    %c0_i32_0 = arith.constant 0 : i32
    %c0_i32_1 = arith.constant 0 : i32
    return %c0_i32, %c0_i32_0 : i32, i32
  }
  func.func @transform_2(%arg0: i32) -> (i32, i32) {
    %c0_i32 = arith.constant 0 : i32
    %c0_i32_0 = arith.constant 0 : i32
    %c0_i32_1 = arith.constant 0 : i32
    return %c0_i32, %c0_i32_0 : i32, i32
  }
  func.func @transform_3(%arg0: i32) -> (i32, i32) {
    %c0_i32 = arith.constant 0 : i32
    %c0_i32_0 = arith.constant 0 : i32
    %c0_i32_1 = arith.constant 0 : i32
    return %c0_i32, %c0_i32_0 : i32, i32
  }
  func.func @transform_4(%arg0: i32) -> (i32, i32) {
    %c0_i32 = arith.constant 0 : i32
    %c0_i32_0 = arith.constant 0 : i32
    %c0_i32_1 = arith.constant 0 : i32
    return %c0_i32, %c0_i32_0 : i32, i32
  }
  func.func @transform_5(%arg0: i32) -> (i32, i32) {
    %c0_i32 = arith.constant 0 : i32
    %c0_i32_0 = arith.constant 0 : i32
    return %arg0, %c0_i32 : i32, i32
  }
}

</mosaic_0001>

<bundles_post_ra>
// kernel: tpu_custom_call.1
= control target key start
LH: loop header
LB: loop body
LE: loop exit
PB: predicated region body
PF: predicated region fallthrough
CT: control target
= control target key end

     0   :  { %10 = vsyncpa [#allocation3], 0  ;;  %s904_s0 = inlined_call_operand.hbm [shape: f32[16,128], index: 0, kind: input, shape index: {}]   ;;  %s905_s1 = inlined_call_operand.hbm [shape: f32[128,128], index: 1, kind: input, shape index: {}]   ;;  %s906_s2 = inlined_call_operand.vmem [shape: f32[1,128], index: 2, kind: input, shape index: {}]   ;;  %s907_s3 = inlined_call_operand.hbm [shape: f32[128,128], index: 3, kind: input, shape index: {}]   ;;  %s908_s4 = inlined_call_operand.vmem [shape: f32[1,128], index: 4, kind: input, shape index: {}]   ;;  %s909_s5 = inlined_call_operand.hbm [shape: f32[16,128], index: 5, kind: output, shape index: {}]  }
   0x1   :  { %12 = vsyncpa [#allocation3 + $0x1], 0 }
   0x2   :  { %13 = vsyncpa [#allocation6], 0 }
   0x3   :  { %14 = vsyncpa [#allocation4], 0 }
   0x4   :  { %16 = vsyncpa [#allocation4 + $0x1], 0  ;;  %s746_s18 = smov 0   ;;  %s748_s19 = smov 0  }
   0x5   :  { %s750_s20 = smov 0   ;;  %s752_s21 = smov 0  }
   0x6 LB: > { %s174_s24 = sshll.u32 %s905_s1, 4  ;;  %s770_s25 = sadd.s32 4294967295, %s710_s21   ;;  %s710_s21 = sphi %s752_s21, %s920_s21   ;;  %s706_s20 = sphi %s750_s20, %s919_s20   ;;  %s702_s19 = sphi %s748_s19, %s918_s19   ;;  %s698_s18 = sphi %s746_s18, %s917_s18   ;;  %s175_s24 = int_to_ptr.hbm [resolvable:$true] %s174_s24 }
   0x7   : > { %p464_p0 = scmp.ge.s32.totalorder %s710_s21, 1  ;;  %p43_p1 = scmp.eq.s32.totalorder %s770_s25, 0 }
   0x8   : > { %p163_p2 = scmp.lt.s32.totalorder %s710_s21, 3  ;;  %s712_s27 = smov [#allocation5]  }
   0x9   : > { %s176_s28 = sshll.u32 %s712_s27, 4  ;;  %s191_s6 = sshll.u32 %s907_s3, 4  ;;  %s177_s28 = int_to_ptr.vmem [resolvable:$true] %s176_s28  ;;  %s192_s6 = int_to_ptr.hbm [resolvable:$true] %s191_s6 }
   0xa   : > { %p775_p3 = pnand %p464_p0, %p163_p2  ;;  %s713_s7 = smov [#allocation7]  }
   0xb   : > { %s193_s8 = sshll.u32 %s713_s7, 4  ;;  %s714_s9 = smov 128   ;;  %s194_s8 = int_to_ptr.vmem [resolvable:$true] %s193_s8 }
   0xc   : > { %p491_p4 = pneg %p775_p3  ;;  %s715_s10 = smov 8  }
   0xd   : > { %s463_s11 = sadd.s32 4294967294, %s710_s21   ;;  %s789_s12 = sadd.s32 1, %s710_s21  }
   0xe   : > { %p492_p6 = pnand %p491_p4, %p43_p1  ;;  %s26_s13 = ssub.s32 %s710_s21, %s789_s12 }
   0xf   : > { %s29_s14 = sadd.s32 1, %s706_s20  ;;  %p27_p7 = scmp.eq.s32.totalorder %s26_s13, 0 }
  0x10   : > { %494 = dma.hbm_to_vmem [thread:$0]  (!%p492_p6), %s175_s24, 2048, %s177_s28, [#allocation6], %s714_s9, %s714_s9, %s715_s10  }
  0x11   : > { %497 = dma.hbm_to_vmem [thread:$0]  (!%p492_p6), %s192_s6, 2048, %s194_s8, [#allocation6], %s714_s9, %s714_s9, %s715_s10  }
  0x12   : > { %p36_p8 = scmp.ne.s32.totalorder %s706_s20, %s702_s19  ;;  %p37_p9 = scmp.eq.s32.totalorder %s710_s21, 0 }
  0x13   : > { %p42_p10 = scmp.ne.s32.totalorder %s702_s19, %s698_s18  ;;  %p150_p13 = scmp.eq.s32.totalorder %s770_s25, 1 }
  0x14   : > { %s800_s15 = scalar_select %p27_p7, %s706_s20, %s29_s14  }
  0x15   : > { %p802_p11 = por %p37_p9, %p36_p8  ;;  %p808_p12 = por %p43_p1, %p42_p10 }
  0x16   : > { %p156_p0 = scmp.eq.s32.totalorder %s463_s11, 1  ;;  %p508_p2 = scmp.lt.s32.totalorder %s710_s21, 2 }
  0x17   : > { %s210_s22 = sand.u32 1, %s706_s20   ;;  %p815_p4 = por %p150_p13, %p36_p8 }
  0x18   : > { %p819_p6 = por %p156_p0, %p42_p10  ;;  %s468_s27 = sshll.u32 %s210_s22, 3 }
  0x19   : > { %s469_s28 = sshll.u32 %s710_s21, 3  ;;  %s214_s7 = scalar_lea.vmem [#allocation2], %s468_s27 }
  0x1a   : > { %s218_s6 = scalar_lea.hbm %s904_s0, %s469_s28  ;;  %s222_s8 = sshll.u32 %s214_s7, 4  ;;  %s223_s8 = int_to_ptr.vmem [resolvable:$true] %s222_s8 }
  0x1b   : > { %s220_s9 = sshll.u32 %s218_s6, 4  ;;  %p829_p7 = pnand %p508_p2, %p802_p11  ;;  %s221_s9 = int_to_ptr.hbm [resolvable:$true] %s220_s9 }
  0x1c   : > { %s211_s11 = scalar_lea.sflag [#allocation3], %s210_s22  ;;  %s610_s13 = sshra.s32 %s221_s9, 4  ;;  %s611_s13 = int_to_ptr.hbm [resolvable:$true] %s610_s13 }
  0x1d   : > { %s612_s14 = scalar_lea.hbm %s611_s13, 8  ;;  %p614_p9 = pneg %p829_p7 }
  0x1e   : > { %p613_p8 = scmp.ne.s32.totalorder %s611_s13, %s612_s14  ;;  %s617_s29 = scalar_lea.hbm %s904_s0, 16 }
  0x1f   : > { %p618_p11 = scmp.lt.s32.totalorder %s611_s13, %s904_s0  ;;  %p619_p0 = scmp.lt.s32.totalorder %s617_s29, %s612_s14 }
  0x20   : > { %p615_p10 = pnand %p614_p9, %p613_p8 }
  0x21   : > { %p620_p2 = por %p619_p0, %p618_p11 }
  0x22   : > { %p616_p13 = pneg %p615_p10 }
  0x24   : > { %p621_p5 = pnand %p620_p2, %p616_p13 }
  0x26   : > { %624 = shalt.err (!%p621_p5)
}
  0x27   : > { %501 = dma.hbm_to_vmem [thread:$0]  (!%p829_p7), %s221_s9, 128, %s223_s8, %s211_s11  }
  0x28   : > { %231 = sbr.rel (%p775_p3) target bundleno = 341 (0x155), region = 40  ;;  %s846_s22 = sand.u32 (!%p775_p3), 1, %s702_s19  }
  0x29   : > { %s471_s6 = sshll.u32 (!%p775_p3), %s846_s22, 3  ;;  %s234_s7 = scalar_lea.sflag (!%p775_p3), [#allocation3], %s846_s22 }
  0x2a   : > { %s852_s13 = scalar_lea.vmem (!%p775_p3), [#allocation2], %s471_s6 }
  0x2d   : > { %685 = dma.done.wait (%p808_p12), %s234_s7, 128  }
  0x2e   : > { %687 = vsyncadd (%p808_p12), %s234_s7, 4294967168 }
  0x2f   : > { %689 = dma.done.wait (%p43_p1), [#allocation6], 4096  }
  0x30   : > { %691 = vsyncadd (%p43_p1), [#allocation6], 4294963200  ;;  %v291_v0 = vld [vmem:[#allocation5 + $0x78] sm:$0xff]  ;;  %v290_v1 = vld [vmem:[#allocation5 + $0x70] sm:$0xff]  ;;  %s476_s8 = sshll.u32 %s770_s25, 3  ;;  %s274_s28 = scalar_lea.vmem [#allocation8], %s471_s6 }
  0x31   : > { %296 = vmatpush.msra.mxu0 %v291_v0  ;;  %v289_v2 = vld [vmem:[#allocation5 + $0x68] sm:$0xff]  ;;  %v288_v3 = vld [vmem:[#allocation5 + $0x60] sm:$0xff]  ;;  %v332_v4 = vld [vmem:[#allocation7 + $0x78] sm:$0xff]  ;;  %s369_s11 = scalar_lea.hbm %s909_s5, %s476_s8  ;;  %s371_s29 = sshll.u32 %s274_s28, 4  ;;  %s372_s29 = int_to_ptr.vmem [resolvable:$true] %s371_s29 }
  0x32   : > { %v287_v5 = vld [vmem:[#allocation5 + $0x58] sm:$0xff]  ;;  %337 = vmatpush.msra.mxu1 %v332_v4  ;;  %v331_v6 = vld [vmem:[#allocation7 + $0x70] sm:$0xff]  ;;  %v330_v7 = vld [vmem:[#allocation7 + $0x68] sm:$0xff]  ;;  %s373_s30 = sshll.u32 %s369_s11, 4  ;;  %s359_s16 = scalar_lea.sflag [#allocation4], %s846_s22  ;;  %s374_s30 = int_to_ptr.hbm [resolvable:$true] %s373_s30 }
  0x33   : > { %297 = vmatpush.msra.mxu0 %v290_v1  ;;  %v286_v8 = vld [vmem:[#allocation5 + $0x50] sm:$0xff]  ;;  %v329_v9 = vld [vmem:[#allocation7 + $0x60] sm:$0xff]  ;;  %v285_v10 = vld [vmem:[#allocation5 + $0x48] sm:$0xff]  ;;  %s654_s25 = sshra.s32 %s374_s30, 4  ;;  %s660_s17 = scalar_lea.hbm %s909_s5, 16  ;;  %s655_s25 = int_to_ptr.hbm [resolvable:$true] %s654_s25 }
  0x34   : > { %338 = vmatpush.msra.mxu1 %v331_v6  ;;  %v328_v11 = vld [vmem:[#allocation7 + $0x58] sm:$0xff]  ;;  %v284_v12 = vld [vmem:[#allocation5 + $0x40] sm:$0xff]  ;;  %v327_v13 = vld [vmem:[#allocation7 + $0x50] sm:$0xff]  ;;  %s656_s7 = scalar_lea.hbm %s655_s25, 8  ;;  %p661_p12 = scmp.lt.s32.totalorder %s655_s25, %s909_s5 }
  0x35   : > { %298 = vmatpush.msra.mxu0 %v289_v2  ;;  %v283_v14 = vld [vmem:[#allocation5 + $0x38] sm:$0xff]  ;;  %v326_v15 = vld [vmem:[#allocation7 + $0x48] sm:$0xff]  ;;  %v282_v16 = vld [vmem:[#allocation5 + $0x30] sm:$0xff]  ;;  %p657_p1 = scmp.ne.s32.totalorder %s655_s25, %s656_s7  ;;  %p662_p7 = scmp.lt.s32.totalorder %s660_s17, %s656_s7 }
  0x36   : > { %339 = vmatpush.msra.mxu1 %v330_v7  ;;  %v325_v17 = vld [vmem:[#allocation7 + $0x40] sm:$0xff]  ;;  %v281_v18 = vld [vmem:[#allocation5 + $0x28] sm:$0xff]  ;;  %v324_v19 = vld [vmem:[#allocation7 + $0x38] sm:$0xff] }
  0x37   : > { %299 = vmatpush.msra.mxu0 %v288_v3  ;;  %v280_v20 = vld [vmem:[#allocation5 + $0x20] sm:$0xff]  ;;  %v323_v21 = vld [vmem:[#allocation7 + $0x30] sm:$0xff]  ;;  %v279_v22 = vld [vmem:[#allocation5 + $0x18] sm:$0xff]  ;;  %p658_p3 = pnand %p657_p1, %p815_p4  ;;  %p663_p8 = por %p662_p7, %p661_p12 }
  0x38   : > { %340 = vmatpush.msra.mxu1 %v329_v9  ;;  %v322_v23 = vld [vmem:[#allocation7 + $0x28] sm:$0xff]  ;;  %v278_v24 = vld [vmem:[#allocation5 + $0x10] sm:$0xff]  ;;  %v321_v25 = vld [vmem:[#allocation7 + $0x20] sm:$0xff] }
  0x39   : > { %300 = vmatpush.msra.mxu0 %v287_v5  ;;  %v277_v26 = vld [vmem:[#allocation5 + $0x8] sm:$0xff]  ;;  %v320_v27 = vld [vmem:[#allocation7 + $0x18] sm:$0xff]  ;;  %v276_v28 = vld [vmem:[#allocation5] sm:$0xff]  ;;  %p659_p5 = pneg %p658_p3 }
  0x3a   : > { %341 = vmatpush.msra.mxu1 %v328_v11  ;;  %v275_v29 = vld [vmem:[%s852_s13] sm:$0xff]  ;;  %v318_v31 = vld [vmem:[#allocation7 + $0x8] sm:$0xff]  ;;  %v317_v32 = vld [vmem:[#allocation7] sm:$0xff] }
  0x3b   : > { %301 = vmatpush.msra.mxu0 %v286_v8  ;;  %v319_v30 = vld [vmem:[#allocation7 + $0x10] sm:$0xff]  ;;  %p664_p9 = pnand %p663_p8, %p659_p5 }
  0x3c   : > { %342 = vmatpush.msra.mxu1 %v327_v13  ;;  %v548_v33 = vld [vmem:[%s906_s2] ss:$0 sm:$0xff] }
  0x3d   : > { %302 = vmatpush.msra.mxu0 %v285_v10  ;;  %v549_v37 = vld [vmem:[%s908_s4] ss:$0 sm:$0xff] }
  0x3e   : > { %343 = vmatpush.msra.mxu1 %v326_v15 }
  0x3f   : > { %303 = vmatpush.msra.mxu0 %v284_v12 }
  0x40   : > { %344 = vmatpush.msra.mxu1 %v325_v17 }
  0x41   : > { %304 = vmatpush.msra.mxu0 %v283_v14 }
  0x42   : > { %345 = vmatpush.msra.mxu1 %v324_v19 }
  0x43   : > { %305 = vmatpush.msra.mxu0 %v282_v16 }
  0x44   : > { %346 = vmatpush.msra.mxu1 %v323_v21 }
  0x45   : > { %306 = vmatpush.msra.mxu0 %v281_v18 }
  0x46   : > { %347 = vmatpush.msra.mxu1 %v322_v23 }
  0x47   : > { %307 = vmatpush.msra.mxu0 %v280_v20 }
  0x48   : > { %348 = vmatpush.msra.mxu1 %v321_v25 }
  0x49   : > { %308 = vmatpush.msra.mxu0 %v279_v22 }
  0x4a   : > { %349 = vmatpush.msra.mxu1 %v320_v27 }
  0x4b   : > { %309 = vmatpush.msra.mxu0 %v278_v24 }
  0x4c   : > { %350 = vmatpush.msra.mxu1 %v319_v30 }
  0x4d   : > { %310 = vmatpush.msra.mxu0 %v277_v26 }
  0x4e   : > { %351 = vmatpush.msra.mxu1 %v318_v31 }
  0x4f   : > { %311 = vmatpush.msra.mxu0 %v276_v28 }
  0x50   : > { %312 = vmatmul.f32.vlgmr.msra.gmra.mxu0 %v275_v29  ;;  %352 = vmatpush.msra.mxu1 %v317_v32 }
  0xcd   : > { %v313_v34 = vpop.f32.mrf.mxu0 }
  0xce   : > { %v314_v35 = vadd.f32 %v548_v33, %v313_v34 }
  0xd0   : > { %v316_v36 = vmax.f32 %v314_v35, 0.0 }
  0xd2   : > { %353 = vmatmul.f32.vlgmr.msra.gmra.mxu1 %v316_v36 }
 0x14f   : > { %v354_v38 = vpop.f32.mrf.mxu1 }
 0x150   : > { %v355_v39 = vadd.f32 %v549_v37, %v354_v38 }
 0x152   : > { %357 = vst [vmem:[%s274_s28] sm:$0xff] %v355_v39 }
 0x153   : > { %667 = shalt.err (!%p664_p9)
}
 0x154   : > { %489 = dma.vmem_to_hbm [thread:$0]  (%p815_p4), %s372_s29, 128, %s374_s30, %s359_s16  }
 0x155 PF: > { %s385_s22 = sand.u32 1, %s698_s18   ;;  %p916_p10 = scmp.ge.s32.totalorder %s710_s21, 2 }
 0x156   : > { %s386_s9 = scalar_lea.sflag [#allocation4], %s385_s22 }
 0x157   : > { %p503_p13 = pnand %p916_p10, %p819_p6 }
 0x159   : > { %p504_p11 = pneg %p503_p13 }
 0x15b   : > { %693 = dma.done.wait (%p504_p11), %s386_s9, 128  }
 0x15c   : > { %695 = vsyncadd (%p504_p11), %s386_s9, 4294967168  ;;  %p19_p0 = scmp.ge.s32.totalorder %s789_s12, 4   ;;  %s917_s18 = smov %s702_s19 }
 0x15d   : > { %s918_s19 = smov %s706_s20  ;;  %s919_s20 = smov %s800_s15 }
 0x15e   : > { %s920_s21 = smov %s789_s12  ;;  %21 = sbr.rel (!%p19_p0) target bundleno = 6 (0x6), region = 93 }
 0x163   :  { %392 = vsyncpa [#allocation3], 1 }
 0x164   :  { %394 = vsyncpa [#allocation3 + $0x1], 1 }
 0x165   :  { %395 = vsyncpa [#allocation6], 1 }
 0x166   :  { %396 = vsyncpa [#allocation4], 1 }
 0x167   :  { %398 = vsyncpa [#allocation4 + $0x1], 1 }

</bundles_post_ra>
